<compile_context>
chip_gen: v5e
topology: v5e:2x2
jax: 0.10.0
libtpu: 0.0.40
codegen_flags: <defaults>
</compile_context>

<pallas_src>
import jax
import jax.numpy as jnp
from jax.experimental import pallas as pl
from jax.experimental.pallas import tpu as pltpu

_LANE = 128
_VMEM_LIMIT = 32 * 1024 * 1024  # comfortably fits the tiles on v5e/v6e/v7x


def _rope_packed_kernel(pos_ref, invsel_ref, cos_ref, sin_ref):
    """Lane-packed RoPE table kernel (dim <= 128 and 128 % dim == 0).

    pos_ref:    (TILE_P, k) f32 -- k consecutive original rows per lane-row
    invsel_ref: (k, 128)    f32 -- invsel[r, j] = inv_full[j % dim] if j//dim == r else 0
                                   with inv_full = concat([inv_freq, inv_freq])
    cos_ref / sin_ref: (TILE_P, 128) in the output dtype.

    emb[p, j] = pos[p, j // dim] * inv_full[j % dim] is built with k
    broadcast-multiply-adds (adding exact zeros -> bit-identical to the
    reference f32 product), then cos/sin run on fully dense 128-lane vregs and
    the stores are unmasked full-lane vst.
    """
    pos = pos_ref[...].astype(jnp.float32)        # (TILE_P, k)
    invsel = invsel_ref[...].astype(jnp.float32)  # (k, 128)
    k = pos.shape[1]
    emb = pos[:, 0:1] * invsel[0:1, :]
    for r in range(1, k):
        emb = emb + pos[:, r:r + 1] * invsel[r:r + 1, :]
    cos_ref[...] = jnp.cos(emb).astype(cos_ref.dtype)
    sin_ref[...] = jnp.sin(emb).astype(sin_ref.dtype)


def _rope_halftrig_kernel(pos_ref, inv_ref, cos_ref, sin_ref):
    """Fallback (dim > 128 or 128 % dim != 0): trig on half-width freqs, then
    lane-duplicate, instead of trig on the duplicated full-width emb."""
    pos = pos_ref[...].astype(jnp.float32)        # (TILE_R, 1)
    inv = inv_ref[...].astype(jnp.float32)        # (1, half)
    freqs = pos * inv                             # (TILE_R, half)
    c = jnp.cos(freqs)
    s = jnp.sin(freqs)
    cos_ref[...] = jnp.concatenate([c, c], axis=-1).astype(cos_ref.dtype)
    sin_ref[...] = jnp.concatenate([s, s], axis=-1).astype(sin_ref.dtype)


def llama_rotary_embedding(x, position_ids, inv_freq, *, tile_rows=1024):
    """Pallas LlamaRotaryEmbedding.forward.

    x:            only supplies the output dtype (as in the PyTorch forward).
    position_ids: (B, S) integer or float positions.
    inv_freq:     (dim//2,) float32 buffer.
    Returns (cos, sin), each (B, S, dim) in x.dtype.
    """
    B, S = position_ids.shape
    half = inv_freq.shape[0]
    dim = 2 * half
    out_dtype = x.dtype

    R = B * S
    pos_flat = position_ids.reshape(R).astype(jnp.float32)
    inv = inv_freq.astype(jnp.float32)

    if dim <= _LANE and _LANE % dim == 0:
        # ---- lane-packed path: pack k = 128 // dim rows per 128-lane row ----
        k = _LANE // dim
        P = -(-R // k)                     # cdiv
        R_pad = P * k
        if R_pad != R:
            pos_flat = jnp.pad(pos_flat, (0, R_pad - R))
        pos2d = pos_flat.reshape(P, k)

        inv_full = jnp.concatenate([inv, inv])            # (dim,) == concat dup
        j = jnp.arange(_LANE)
        inv_sel = jnp.where(
            (j[None, :] // dim) == jnp.arange(k)[:, None],
            inv_full[j % dim][None, :],
            0.0,
        ).astype(jnp.float32)                             # (k, 128)

        tile_p = min(P, tile_rows)
        if tile_p < P and tile_p % 8 != 0:
            tile_p = max(8, (tile_p // 8) * 8)
        grid = (pl.cdiv(P, tile_p),)

        cos_p, sin_p = pl.pallas_call(
            _rope_packed_kernel,
            out_shape=(
                jax.ShapeDtypeStruct((P, _LANE), out_dtype),
                jax.ShapeDtypeStruct((P, _LANE), out_dtype),
            ),
            grid_spec=pltpu.PrefetchScalarGridSpec(
                num_scalar_prefetch=0,
                grid=grid,
                in_specs=[
                    pl.BlockSpec((tile_p, k), lambda i: (i, 0)),       # positions (per tile)
                    pl.BlockSpec((k, _LANE), lambda i: (0, 0)),        # tiny constant table
                ],
                out_specs=[
                    pl.BlockSpec((tile_p, _LANE), lambda i: (i, 0)),
                    pl.BlockSpec((tile_p, _LANE), lambda i: (i, 0)),
                ],
            ),
            compiler_params=pltpu.CompilerParams(
                dimension_semantics=("parallel",),
                vmem_limit_bytes=_VMEM_LIMIT,
            ),
        )(pos2d, inv_sel)

        cos = cos_p.reshape(R_pad, dim)
        sin = sin_p.reshape(R_pad, dim)
        if R_pad != R:
            cos = cos[:R]
            sin = sin[:R]
        return cos.reshape(B, S, dim), sin.reshape(B, S, dim)

    # ---- fallback path (dim > 128 or dim does not divide 128) ----
    pos2d = pos_flat.reshape(R, 1)
    inv2d = inv.reshape(1, half)
    tile_r = min(R, tile_rows)
    if tile_r < R and tile_r % 8 != 0:
        tile_r = max(8, (tile_r // 8) * 8)
    grid = (pl.cdiv(R, tile_r),)

    cos_f, sin_f = pl.pallas_call(
        _rope_halftrig_kernel,
        out_shape=(
            jax.ShapeDtypeStruct((R, dim), out_dtype),
            jax.ShapeDtypeStruct((R, dim), out_dtype),
        ),
        grid_spec=pltpu.PrefetchScalarGridSpec(
            num_scalar_prefetch=0,
            grid=grid,
            in_specs=[
                pl.BlockSpec((tile_r, 1), lambda i: (i, 0)),
                pl.BlockSpec((1, half), lambda i: (0, 0)),
            ],
            out_specs=[
                pl.BlockSpec((tile_r, dim), lambda i: (i, 0)),
                pl.BlockSpec((tile_r, dim), lambda i: (i, 0)),
            ],
        ),
        compiler_params=pltpu.CompilerParams(
            dimension_semantics=("parallel",),
            vmem_limit_bytes=_VMEM_LIMIT,
        ),
    )(pos2d, inv2d)
    return cos_f.reshape(B, S, dim), sin_f.reshape(B, S, dim)


def make_inv_freq(dim, base=10000.0):
    # Mirrors the module's __init__.
    exponents = jnp.arange(0, dim, 2, dtype=jnp.float32) / float(dim)
    return 1.0 / (base ** exponents)     # (dim//2,)


def _reference(x, position_ids, inv_freq):
    # Pure-JAX reference of the PyTorch forward.
    freqs = position_ids.astype(jnp.float32)[:, :, None] * \
        inv_freq.astype(jnp.float32)[None, None, :]
    emb = jnp.concatenate([freqs, freqs], axis=-1)
    return jnp.cos(emb).astype(x.dtype), jnp.sin(emb).astype(x.dtype)


if __name__ == "__main__":
    key = jax.random.PRNGKey(0)
    k_x, _ = jax.random.split(key)

    # --- Test 1: small shapes (B=2, S=8, dim=32), f32 ---
    B, S, DIM = 2, 8, 32
    x = jax.random.normal(k_x, (B, S, DIM), dtype=jnp.float32)
    position_ids = jnp.broadcast_to(jnp.arange(S, dtype=jnp.int32)[None, :], (B, S))
    inv_freq = make_inv_freq(DIM, base=10000.0)

    cos, sin = llama_rotary_embedding(x, position_ids, inv_freq)
    cos = jax.block_until_ready(cos)
    sin = jax.block_until_ready(sin)

    cos_ref, sin_ref = _reference(x, position_ids, inv_freq)
    assert cos.shape == (B, S, DIM) and sin.shape == (B, S, DIM)
    assert cos.dtype == x.dtype and sin.dtype == x.dtype
    assert jnp.allclose(cos, cos_ref, atol=1e-5, rtol=1e-5)
    assert jnp.allclose(sin, sin_ref, atol=1e-5, rtol=1e-5)

    # --- Test 2: multi-tile grid (B=2, S=2048, dim=64), bf16 output dtype ---
    B2, S2, DIM2 = 2, 2048, 64
    x2 = jnp.zeros((B2, S2, DIM2), dtype=jnp.bfloat16)
    pos2 = jnp.broadcast_to(jnp.arange(S2, dtype=jnp.int32)[None, :], (B2, S2))
    inv2 = make_inv_freq(DIM2, base=10000.0)

    cos2, sin2 = llama_rotary_embedding(x2, pos2, inv2)
    cos2 = jax.block_until_ready(cos2)
    sin2 = jax.block_until_ready(sin2)

    cr2, sr2 = _reference(x2, pos2, inv2)
    assert cos2.shape == (B2, S2, DIM2) and cos2.dtype == jnp.bfloat16
    assert jnp.allclose(cos2.astype(jnp.float32), cr2.astype(jnp.float32), atol=4e-2)
    assert jnp.allclose(sin2.astype(jnp.float32), sr2.astype(jnp.float32), atol=4e-2)

    print("KERNEL_OK")
</pallas_src>

<mosaic_0001>
module attributes {stable_mosaic.version = 11 : i64} {
  func.func @_rope_packed_kernel(%arg0: i32, %arg1: memref<4x4xf32, #tpu.memory_space<vmem>>, %arg2: memref<4x128xf32, #tpu.memory_space<vmem>>, %arg3: memref<4x128xf32, #tpu.memory_space<vmem>>, %arg4: memref<4x128xf32, #tpu.memory_space<vmem>>) attributes {dimension_semantics = [#tpu.dimension_semantics<parallel>], iteration_bounds = array<i64: 1>, scalar_prefetch = 0 : i64, scratch_operands = 0 : i64, tpu.core_type = #tpu.core_type<tc>, window_params = [{transform_indices = @transform_0, window_bounds = array<i64: 4, 4>}, {pipeline_mode = #tpu.pipeline_mode<synchronous>, transform_indices = @transform_1, window_bounds = array<i64: 4, 128>}, {transform_indices = @transform_2, window_bounds = array<i64: 4, 128>}, {transform_indices = @transform_3, window_bounds = array<i64: 4, 128>}]} {
    %c0 = arith.constant 0 : index
    %c0_0 = arith.constant 0 : index
    %0 = vector.load %arg1[%c0, %c0_0] : memref<4x4xf32, #tpu.memory_space<vmem>>, vector<4x4xf32>
    %c0_1 = arith.constant 0 : index
    %c0_2 = arith.constant 0 : index
    %1 = vector.load %arg2[%c0_1, %c0_2] : memref<4x128xf32, #tpu.memory_space<vmem>>, vector<4x128xf32>
    %2 = vector.extract_strided_slice %0 {offsets = [0, 0], sizes = [4, 1], strides = [1, 1]} : vector<4x4xf32> to vector<4x1xf32>
    %3 = vector.extract_strided_slice %1 {offsets = [0, 0], sizes = [1, 128], strides = [1, 1]} : vector<4x128xf32> to vector<1x128xf32>
    %4 = vector.broadcast %2 : vector<4x1xf32> to vector<4x128xf32>
    %5 = vector.broadcast %3 : vector<1x128xf32> to vector<4x128xf32>
    %6 = arith.mulf %4, %5 : vector<4x128xf32>
    %7 = vector.extract_strided_slice %0 {offsets = [0, 1], sizes = [4, 1], strides = [1, 1]} : vector<4x4xf32> to vector<4x1xf32>
    %8 = vector.extract_strided_slice %1 {offsets = [1, 0], sizes = [1, 128], strides = [1, 1]} : vector<4x128xf32> to vector<1x128xf32>
    %9 = vector.broadcast %7 : vector<4x1xf32> to vector<4x128xf32>
    %10 = vector.broadcast %8 : vector<1x128xf32> to vector<4x128xf32>
    %11 = arith.mulf %9, %10 : vector<4x128xf32>
    %12 = arith.addf %6, %11 : vector<4x128xf32>
    %13 = vector.extract_strided_slice %0 {offsets = [0, 2], sizes = [4, 1], strides = [1, 1]} : vector<4x4xf32> to vector<4x1xf32>
    %14 = vector.extract_strided_slice %1 {offsets = [2, 0], sizes = [1, 128], strides = [1, 1]} : vector<4x128xf32> to vector<1x128xf32>
    %15 = vector.broadcast %13 : vector<4x1xf32> to vector<4x128xf32>
    %16 = vector.broadcast %14 : vector<1x128xf32> to vector<4x128xf32>
    %17 = arith.mulf %15, %16 : vector<4x128xf32>
    %18 = arith.addf %12, %17 : vector<4x128xf32>
    %19 = vector.extract_strided_slice %0 {offsets = [0, 3], sizes = [4, 1], strides = [1, 1]} : vector<4x4xf32> to vector<4x1xf32>
    %20 = vector.extract_strided_slice %1 {offsets = [3, 0], sizes = [1, 128], strides = [1, 1]} : vector<4x128xf32> to vector<1x128xf32>
    %21 = vector.broadcast %19 : vector<4x1xf32> to vector<4x128xf32>
    %22 = vector.broadcast %20 : vector<1x128xf32> to vector<4x128xf32>
    %23 = arith.mulf %21, %22 : vector<4x128xf32>
    %24 = arith.addf %18, %23 : vector<4x128xf32>
    %25 = math.cos %24 : vector<4x128xf32>
    %c0_3 = arith.constant 0 : index
    %c0_4 = arith.constant 0 : index
    %26 = vector.load %arg3[%c0_3, %c0_4] : memref<4x128xf32, #tpu.memory_space<vmem>>, vector<4x128xf32>
    tpu.vector_store %arg3[%c0_3, %c0_4], %25 {strides = array<i32>} : memref<4x128xf32, #tpu.memory_space<vmem>>, vector<4x128xf32>,
    %27 = math.sin %24 : vector<4x128xf32>
    %c0_5 = arith.constant 0 : index
    %c0_6 = arith.constant 0 : index
    %28 = vector.load %arg4[%c0_5, %c0_6] : memref<4x128xf32, #tpu.memory_space<vmem>>, vector<4x128xf32>
    tpu.vector_store %arg4[%c0_5, %c0_6], %27 {strides = array<i32>} : memref<4x128xf32, #tpu.memory_space<vmem>>, vector<4x128xf32>,
    return
  }
  func.func @transform_0(%arg0: i32) -> (i32, i32) {
    %c0_i32 = arith.constant 0 : i32
    %c0_i32_0 = arith.constant 0 : i32
    return %arg0, %c0_i32 : i32, i32
  }
  func.func @transform_1(%arg0: i32) -> (i32, i32) {
    %c0_i32 = arith.constant 0 : i32
    %c0_i32_0 = arith.constant 0 : i32
    %c0_i32_1 = arith.constant 0 : i32
    return %c0_i32, %c0_i32_0 : i32, i32
  }
  func.func @transform_2(%arg0: i32) -> (i32, i32) {
    %c0_i32 = arith.constant 0 : i32
    %c0_i32_0 = arith.constant 0 : i32
    return %arg0, %c0_i32 : i32, i32
  }
  func.func @transform_3(%arg0: i32) -> (i32, i32) {
    %c0_i32 = arith.constant 0 : i32
    %c0_i32_0 = arith.constant 0 : i32
    return %arg0, %c0_i32 : i32, i32
  }
}

</mosaic_0001>

<bundles_post_ra>
// kernel: tpu_custom_call.1
= control target key start
LH: loop header
LB: loop body
LE: loop exit
PB: predicated region body
PF: predicated region fallthrough
CT: control target
= control target key end

     0   :  { %9 = vsyncpa [#allocation3], 0  ;;  %s655_s0 = inlined_call_operand.hbm [shape: f32[4,4], index: 0, kind: input, shape index: {}]   ;;  %s656_s1 = inlined_call_operand.hbm [shape: f32[4,128], index: 1, kind: input, shape index: {}]   ;;  %s657_s2 = inlined_call_operand.hbm [shape: f32[4,128], index: 2, kind: output, shape index: {0}]   ;;  %s658_s3 = inlined_call_operand.hbm [shape: f32[4,128], index: 3, kind: output, shape index: {1}]  }
   0x1   :  { %10 = vsyncpa [#allocation6], 0 }
   0x2   :  { %11 = vsyncpa [#allocation4], 0 }
   0x3   :  { %12 = vsyncpa [#allocation9], 0  ;;  %s18_s14 = sshll.u32 %s655_s0, 4  ;;  %s547_s15 = smov [#allocation2]   ;;  %s19_s14 = int_to_ptr.hbm [resolvable:$true] %s18_s14 }
   0x4   :  { %s20_s16 = sshll.u32 %s547_s15, 4  ;;  %s29_s19 = sshll.u32 %s656_s1, 4  ;;  %s21_s16 = int_to_ptr.vmem [resolvable:$true] %s20_s16  ;;  %s30_s19 = int_to_ptr.hbm [resolvable:$true] %s29_s19 }
   0x5   :  { %23 = dma.hbm_to_vmem [thread:$0]  %s19_s14, 64, %s21_s16, [#allocation3]  }
   0x6   :  { %s548_s20 = smov [#allocation5]  }
   0x7   :  { %s31_s21 = sshll.u32 %s548_s20, 4  ;;  %s32_s21 = int_to_ptr.vmem [resolvable:$true] %s31_s21 }
   0x8   :  { %34 = dma.hbm_to_vmem [thread:$0]  %s30_s19, 64, %s32_s21, [#allocation6]  }
   0x9   :  { %539 = dma.done.wait [#allocation3], 64  }
   0xa   :  { %540 = vsyncadd [#allocation3], 4294967232 }
   0xb   :  { %541 = dma.done.wait [#allocation6], 64  }
   0xc   :  { %542 = vsyncadd [#allocation6], 4294967232  ;;  %v549_v0 = vmov 0   ;;  %v550_v1 = vmov 2   ;;  %v43_v2 = vld [vmem:[#allocation2] sm:$0xf] }
   0xd   :  { %438 = vset.pattern.permute.xlu0 %v549_v0  ;;  %440 = vset.pattern.permute.xlu1 %v550_v1  ;;  %v551_v3 = vmov 1   ;;  %v552_v4 = vmov 3   ;;  %v44_v7 = vld [vmem:[#allocation5] sm:$0xf]  ;;  %v553_v32 = vmov 683565275  }
   0xe   :  { %47 = vperm.xlu0 %438, %v43_v2   ;;  %60 = vperm.xlu1 %440, %v43_v2   ;;  %v50_v8 = vperm.slane %v44_v7, 0  ;;  %v56_v9 = vperm.slane %v44_v7, 1  ;;  %v63_v10 = vperm.slane %v44_v7, 2  ;;  %v70_v11 = vperm.slane %v44_v7, 3  ;;  %s559_s0 = smov [#allocation7]   ;;  %s391_s24 = sshll.u32 %s657_s2, 4  ;;  %s392_s24 = int_to_ptr.hbm [resolvable:$true] %s391_s24 }
   0xf   :  { %v554_v34 = vmov 2475754826   ;;  %v555_v37 = vmov 2131351028   ;;  %v556_v40 = vmov 2102212464  }
  0x10   :  { %v557_v43 = vmov 920167782   ;;  %v558_v46 = vmov 1326507024   ;;  %s389_s1 = sshll.u32 %s559_s0, 4  ;;  %s560_s25 = smov [#allocation8]   ;;  %s390_s1 = int_to_ptr.vmem [resolvable:$true] %s389_s1 }
  0x11   :  { %s400_s26 = sshll.u32 %s560_s25, 4  ;;  %s402_s29 = sshll.u32 %s658_s3, 4  ;;  %s401_s26 = int_to_ptr.vmem [resolvable:$true] %s400_s26  ;;  %s403_s29 = int_to_ptr.hbm [resolvable:$true] %s402_s29 }
  0x16   :  { %439 = vset.pattern.permute.xlu0 %v551_v3  ;;  %441 = vset.pattern.permute.xlu1 %v552_v4 }
  0x17   :  { %53 = vperm.xlu0 %439, %v43_v2   ;;  %67 = vperm.xlu1 %441, %v43_v2  }
  0x1f   :  { %442 = vset.pattern.permute.xlu0 %v552_v4 }
  0x80   :  { %v48_v5 = vpop.permute.xlu0 %47  ;;  %v61_v6 = vpop.permute.xlu1 %60 }
  0x81   :  { %v51_v14 = vmul.f32 %v50_v8, %v48_v5  ;;  %v64_v16 = vmul.f32 %v63_v10, %v61_v6 }
  0x89   :  { %v54_v12 = vpop.permute.xlu0 %53  ;;  %v68_v13 = vpop.permute.xlu1 %67 }
  0x8a   :  { %v57_v15 = vmul.f32 %v56_v9, %v54_v12  ;;  %v71_v18 = vmul.f32 %v70_v11, %v68_v13 }
  0x8c   :  { %v58_v17 = vadd.f32 %v57_v15, %v51_v14 }
  0x8e   :  { %v65_v19 = vadd.f32 %v64_v16, %v58_v17 }
  0x90   :  { %v588_v20 = vadd.f32 %v71_v18, %v65_v19 }
  0x92   :  { %v76_v21 = vand.u32 2139095040, %v588_v20  ;;  %v73_v24 = vand.u32 2147483647, %v588_v20  ;;  %vm75_vm12 = vcmp.lt.s32.totalorder %v588_v20, 0 }
  0x94   :  { %v77_v22 = vshrl.u32 %v76_v21, 23  ;;  %v80_v26 = vand.u32 8388607, %v73_v24  ;;  %vm74_vm13 = vcmp.le.f32.partialorder %v73_v24, 0.7853982 }
  0x96   :  { %v418_v23 = vadd.s32 4294967169, %v77_v22  ;;  %v81_v30 = vor.u32 8388608, %v80_v26 }
  0x98   :  { %v83_v25 = vadd.s32 1, %v418_v23  ;;  %v605_v53 = vshll.u32 %v81_v30, 8 }
  0x9a   :  { %vm84_vm0 = vcmp.gt.s32.totalorder %v83_v25, 0  ;;  %v122_v62 = vand.u32 65535, %v605_v53  ;;  %v123_v4 = vshrl.u32 %v605_v53, 16 }
  0x9b   :  { %v85_v27 = vsel %vm84_vm0, %v83_v25, 0 }
  0x9c   :  { %v87_v28 = vand.u32 31, %v85_v27  ;;  %v596_v31 = vshrl.u32 %v85_v27, 5 }
  0x9e   :  { %v594_v29 = vsub.s32 32, %v87_v28  ;;  %v90_v33 = vshll.u32 %v553_v32, %v87_v28  ;;  %v93_v35 = vshll.u32 %v554_v34, %v87_v28  ;;  %v96_v39 = vshll.u32 %v555_v37, %v87_v28 }
  0x9f   :  { %v99_v42 = vshll.u32 %v556_v40, %v87_v28  ;;  %v102_v45 = vshll.u32 %v557_v43, %v87_v28  ;;  %vm105_vm1 = vcmp.lt.s32.totalorder %v596_v31, 1  ;;  %vm108_vm2 = vcmp.lt.s32.totalorder %v596_v31, 4 }
  0xa0   :  { %v91_v36 = vshrl.u32 %v554_v34, %v594_v29  ;;  %v94_v38 = vshrl.u32 %v555_v37, %v594_v29  ;;  %v97_v41 = vshrl.u32 %v556_v40, %v594_v29  ;;  %v100_v44 = vshrl.u32 %v557_v43, %v594_v29 }
  0xa1   :  { %v103_v47 = vshrl.u32 %v558_v46, %v594_v29  ;;  %vm107_vm3 = vcmp.lt.s32.totalorder %v596_v31, 3  ;;  %vm106_vm4 = vcmp.lt.s32.totalorder %v596_v31, 2  ;;  %v89_v26 = vshrl.u32 %v553_v32, %v594_v29 }
  0xa2   :  { %v92_v48 = vor.u32 %v91_v36, %v90_v33  ;;  %v95_v49 = vor.u32 %v94_v38, %v93_v35  ;;  %v98_v50 = vor.u32 %v97_v41, %v96_v39  ;;  %v101_v51 = vor.u32 %v100_v44, %v99_v42 }
  0xa3   :  { %v104_v52 = vor.u32 %v103_v47, %v102_v45 }
  0xa4   :  { %v113_v54 = vsel %vm105_vm1, %v92_v48, %v95_v49  ;;  %v117_v55 = vsel %vm105_vm1, %v95_v49, %v98_v50  ;;  %v114_v56 = vsel %vm108_vm2, %v101_v51, 920167782  ;;  %v110_v19 = vsel %vm108_vm2, %v98_v50, 2102212464 }
  0xa5   :  { %v118_v57 = vsel %vm108_vm2, %v104_v52, 1326507024  ;;  %v115_v58 = vsel %vm107_vm3, %v98_v50, %v114_v56  ;;  %v109_v36 = vsel %vm105_vm1, %v89_v26, %v92_v48  ;;  %v111_v37 = vsel %vm107_vm3, %v95_v49, %v110_v19 }
  0xa6   :  { %v119_v59 = vsel %vm107_vm3, %v101_v51, %v118_v57  ;;  %v116_v60 = vsel %vm106_vm4, %v113_v54, %v115_v58  ;;  %v112_v29 = vsel %vm106_vm4, %v109_v36, %v111_v37 }
  0xa7   :  { %v120_v61 = vsel %vm106_vm4, %v117_v55, %v119_v59  ;;  %v146_v2 = vand.u32 65535, %v116_v60  ;;  %v147_v3 = vshrl.u32 %v116_v60, 16  ;;  %v166_v44 = vmul.u32 %v605_v53, %v112_v29 }
  0xa8   :  { %v124_v63 = vand.u32 65535, %v120_v61  ;;  %v125_v1 = vshrl.u32 %v120_v61, 16  ;;  %vm216_vm4 = vweird.f32 %v588_v20 }
  0xa9   :  { %v149_v6 = vmul.u32 %v147_v3, %v122_v62  ;;  %v150_v8 = vmul.u32 %v146_v2, %v123_v4  ;;  %v148_v11 = vmul.u32 %v146_v2, %v122_v62  ;;  %v151_v14 = vmul.u32 %v147_v3, %v123_v4 }
  0xaa   :  { %v127_v5 = vmul.u32 %v125_v1, %v122_v62  ;;  %v128_v7 = vmul.u32 %v124_v63, %v123_v4  ;;  %v126_v9 = vmul.u32 %v124_v63, %v122_v62  ;;  %v129_v13 = vmul.u32 %v125_v1, %v123_v4 }
  0xab   :  { %v152_v12 = vshll.u32 %v149_v6, 16  ;;  %v154_v16 = vshll.u32 %v150_v8, 16  ;;  %v153_v34 = vshrl.u32 %v149_v6, 16  ;;  %v155_v40 = vshrl.u32 %v150_v8, 16 }
  0xac   :  { %v130_v10 = vshll.u32 %v127_v5, 16  ;;  %v132_v15 = vshll.u32 %v128_v7, 16  ;;  %v131_v30 = vshrl.u32 %v127_v5, 16  ;;  %v133_v38 = vshrl.u32 %v128_v7, 16 }
  0xad   :  { %vm156_vm6 = vc.u32 %v148_v11, %v152_v12  ;;  %v158_v18 = vadd.s32 %v152_v12, %v148_v11 }
  0xae   :  { %vm134_vm5 = vc.u32 %v126_v9, %v130_v10  ;;  %v136_v17 = vadd.s32 %v130_v10, %v126_v9  ;;  %v157_v22 = vsel %vm156_vm6, 1, %v549_v0 }
  0xaf   :  { %v135_v21 = vsel %vm134_vm5, 1, %v549_v0  ;;  %v159_v25 = vadd.s32 %v157_v22, %v151_v14  ;;  %vm160_vm8 = vc.u32 %v158_v18, %v154_v16  ;;  %v162_v42 = vadd.s32 %v158_v18, %v154_v16 }
  0xb0   :  { %v137_v23 = vadd.s32 %v135_v21, %v129_v13  ;;  %vm138_vm7 = vc.u32 %v136_v17, %v132_v15  ;;  %v161_v28 = vsel %vm160_vm8, 1, %v549_v0 }
  0xb1   :  { %v139_v27 = vsel %vm138_vm7, 1, %v549_v0  ;;  %v163_v35 = vadd.s32 %v161_v28, %v159_v25 }
  0xb2   :  { %v141_v33 = vadd.s32 %v139_v27, %v137_v23 }
  0xb3   :  { %v164_v41 = vadd.s32 %v163_v35, %v153_v34 }
  0xb4   :  { %v142_v39 = vadd.s32 %v141_v33, %v131_v30 }
  0xb5   :  { %v165_v0 = vadd.s32 %v164_v41, %v155_v40 }
  0xb6   :  { %v143_v32 = vadd.s32 %v142_v39, %v133_v38 }
  0xb7   :  { %v169_v43 = vadd.s32 1, %v165_v0 }
  0xb8   :  { %vm168_vm9 = vc.u32 %v143_v32, %v162_v42  ;;  %v167_v56 = vadd.s32 %v162_v42, %v143_v32 }
  0xb9   :  { %v170_v45 = vsel %vm168_vm9, %v169_v43, %v165_v0 }
  0xba   :  { %v171_v46 = vadd.s32 %v170_v45, %v166_v44 }
  0xbc   :  { %v172_v47 = vadd.s32 536870912, %v171_v46 }
  0xbe   :  { %v173_v48 = vshrl.u32 %v172_v47, 30 }
  0xc0   :  { %v174_v50 = vshll.u32 %v173_v48, 30  ;;  %v197_v6 = vsub.s32 4, %v173_v48 }
  0xc2   :  { %v175_v49 = vsub.s32 %v171_v46, %v174_v50  ;;  %v198_v11 = vsel %vm75_vm12, %v197_v6, %v173_v48 }
  0xc3   :  { %v200_v14 = vsel %vm74_vm13, 0, %v198_v11 }
  0xc4   :  { %vm176_vm10 = vcmp.lt.s32.totalorder %v175_v49, 0  ;;  %v177_v51 = vsub.s32 0, %v175_v49  ;;  %v372_v19 = vadd.s32 3, %v200_v14  ;;  %v217_v25 = vand.u32 3, %v200_v14 }
  0xc6   :  { %v178_v52 = vsel %vm176_vm10, %v177_v51, %v175_v49  ;;  %v373_v26 = vand.u32 3, %v372_v19  ;;  %vm218_vm14 = vcmp.lt.s32.totalorder %v217_v25, 2  ;;  %vm219_vm15 = vcmp.eq.s32.totalorder %v217_v25, 0 }
  0xc7   :  { %v179_v54 = vclz %v178_v52  ;;  %vm222_vm0 = vcmp.eq.s32.totalorder %v217_v25, 2 }
  0xc8   :  { %vm374_vm1 = vcmp.lt.s32.totalorder %v373_v26, 2  ;;  %vm375_vm2 = vcmp.eq.s32.totalorder %v373_v26, 0  ;;  %vm378_vm3 = vcmp.eq.s32.totalorder %v373_v26, 2 }
  0xc9   :  { %v419_v55 = vadd.s32 4294967294, %v179_v54 }
  0xcb   :  { %vm420_vm11 = vcmp.lt.s32.totalorder %v419_v55, 0 }
  0xcc   :  { %v182_v31 = vsel %vm420_vm11, 0, %v419_v55 }
  0xcd   :  { %v183_v57 = vsub.s32 32, %v182_v31  ;;  %v187_v58 = vsub.s32 4294967266, %v182_v31  ;;  %v184_v59 = vshll.u32 %v175_v49, %v182_v31 }
  0xcf   :  { %v185_v60 = vshrl.u32 %v167_v56, %v183_v57  ;;  %v188_v61 = vadd.s32 127, %v187_v58 }
  0xd1   :  { %v186_v53 = vor.u32 %v185_v60, %v184_v59  ;;  %v189_v62 = vshll.u32 %v188_v61, 23 }
  0xd3   :  { %v190_v63 = vor.u32 4788187, %v189_v62  ;;  %v193_v2 = vcvt.s32.f32 %v186_v53 }
  0xd5   :  { %v191_v1 = vand.u32 2147483647, %v190_v63 }
  0xd7   :  { %v194_v3 = vmul.f32 %v193_v2, %v191_v1 }
  0xd9   :  { %v195_v4 = vxor.u32 2147483648, %v194_v3 }
  0xdb   :  { %v196_v5 = vsel %vm75_vm12, %v195_v4, %v194_v3 }
  0xdc   :  { %v199_v7 = vsel %vm74_vm13, %v588_v20, %v196_v5 }
  0xdd   :  { %v201_v8 = vmul.f32 %v199_v7, %v199_v7 }
  0xdf   :  { %v202_v9 = vmul.f32 -0.001358992, %v201_v8  ;;  %v209_v10 = vmul.f32 -0.00019511016, %v201_v8 }
  0xe1   :  { %v203_v12 = vadd.f32 0.041655596, %v202_v9  ;;  %v210_v13 = vadd.f32 0.008332121, %v209_v10 }
  0xe3   :  { %v204_v15 = vmul.f32 %v203_v12, %v201_v8  ;;  %v211_v16 = vmul.f32 %v210_v13, %v201_v8 }
  0xe5   :  { %v205_v17 = vadd.f32 -0.4999988, %v204_v15  ;;  %v212_v18 = vadd.f32 -0.16666654, %v211_v16 }
  0xe7   :  { %v206_v21 = vmul.f32 %v205_v17, %v201_v8  ;;  %v213_v22 = vmul.f32 %v212_v18, %v201_v8 }
  0xe9   :  { %v207_v23 = vadd.f32 1.0, %v206_v21  ;;  %v214_v24 = vadd.f32 1.0, %v213_v22 }
  0xeb   :  { %v215_v27 = vmul.f32 %v214_v24, %v199_v7  ;;  %v223_v28 = vxor.u32 2147483648, %v207_v23 }
  0xed   :  { %v220_v30 = vxor.u32 2147483648, %v215_v27  ;;  %v224_v34 = vsel %vm222_vm0, %v223_v28, %v215_v27  ;;  %v380_v36 = vsel %vm378_vm3, %v223_v28, %v215_v27 }
  0xef   :  { %v221_v33 = vsel %vm219_vm15, %v207_v23, %v220_v30  ;;  %v377_v35 = vsel %vm375_vm2, %v207_v23, %v220_v30 }
  0xf0   :  { %v225_v37 = vsel %vm218_vm14, %v221_v33, %v224_v34  ;;  %v381_v38 = vsel %vm374_vm1, %v377_v35, %v380_v36 }
  0xf1   :  { %v226_v39 = vsel %vm216_vm4, nan, %v225_v37  ;;  %v382_v40 = vsel %vm216_vm4, nan, %v381_v38 }
  0xf2   :  { %227 = vst [vmem:[#allocation7] sm:$0xf] %v226_v39 }
  0xf3   :  { %394 = dma.vmem_to_hbm [thread:$0]  %s390_s1, 64, %s392_s24, [#allocation4]   ;;  %383 = vst [vmem:[#allocation8] sm:$0xf] %v382_v40 }
  0xf4   :  { %405 = dma.vmem_to_hbm [thread:$0]  %s401_s26, 64, %s403_s29, [#allocation9]  }
  0xf5   :  { %543 = dma.done.wait [#allocation4], 64  }
  0xf6   :  { %544 = vsyncadd [#allocation4], 4294967232 }
  0xf7   :  { %545 = dma.done.wait [#allocation9], 64  }
  0xf8   :  { %546 = vsyncadd [#allocation9], 4294967232 }
  0xf9   :  { %414 = vsyncpa [#allocation3], 1 }
  0xfa   :  { %415 = vsyncpa [#allocation6], 1 }
  0xfb   :  { %416 = vsyncpa [#allocation4], 1 }
  0xfc   :  { %417 = vsyncpa [#allocation9], 1 }

</bundles_post_ra>
